<compile_context>
chip_gen: v6e
topology: v6e:2x2x1
jax: 0.10.0
libtpu: 0.0.40
codegen_flags: <defaults>
</compile_context>

<pallas_src>
import functools
import math

import jax
import jax.numpy as jnp
from jax.experimental import pallas as pl
from jax.experimental.pallas import tpu as pltpu


def _focal_loss2_kernel(x_ref, t_ref, out_ref, *, gamma, log_lo, log_hi):
    x = x_ref[...].astype(jnp.float32)                        # (rt, C)
    t = t_ref[...]                                            # (rt, 1) int32 (-1 = padded row)

    # Numerically stable log-sum-exp over the class (lane) axis.
    m = jnp.max(x, axis=-1, keepdims=True)                    # (rt, 1)
    e = jnp.exp(x - m)                                        # only full-tile transcendental
    lse = m + jnp.log(jnp.sum(e, axis=-1, keepdims=True))     # (rt, 1)

    # Logit at the target class via one-hot compare + masked lane reduction.
    col = jax.lax.broadcasted_iota(jnp.int32, x.shape, 1)     # (rt, C)
    x_t = jnp.sum(jnp.where(col == t, x, 0.0), axis=-1, keepdims=True)   # (rt, 1)

    # clamp(p, eps, 1-eps) before the log  <=>  clamp(log p, log eps, log(1-eps))
    logp = jnp.clip(x_t - lse, jnp.float32(log_lo), jnp.float32(log_hi))  # (rt, 1)

    if gamma == 0.0:
        loss_rows = -logp                                     # (1-p)**0 == 1: skip entirely
    else:
        p = jnp.exp(logp)
        omp = 1.0 - p
        if float(gamma).is_integer() and 0.0 < gamma <= 4.0:
            w = omp
            for _ in range(int(gamma) - 1):                   # small integer power: VPU muls
                w = w * omp
        else:
            w = omp ** jnp.float32(gamma)                     # generic float power
        loss_rows = -logp * w

    loss_rows = jnp.where(t >= 0, loss_rows, 0.0)             # zero out padded rows

    partial = jnp.sum(loss_rows)                              # per-tile partial sum (scalar)
    out_ref[...] = jnp.broadcast_to(partial, out_ref.shape)   # lane-dense, unmasked store


def focal_loss2(inputs, targets, *, gamma=0.0, eps=1e-7, row_tile=1024,
                vmem_tile_budget_bytes=2 * 1024 * 1024):
    """inputs: (N, C) float, targets: (N,) int -> scalar float32 loss (sum reduction)."""
    N, C = inputs.shape
    targets = targets.reshape(N).astype(jnp.int32)

    # Row-tile selection: as large as the per-pipeline-buffer VMEM budget allows,
    # rounded to a sublane multiple and never larger than N (rounded up to 8).
    rows_by_budget = max(8, vmem_tile_budget_bytes // (C * 4))
    rt = max(8, (min(int(row_tile), int(rows_by_budget)) // 8) * 8)
    rt = min(rt, ((N + 7) // 8) * 8)

    num_tiles = -(-N // rt)
    n_pad = num_tiles * rt
    if n_pad != N:
        inputs = jnp.pad(inputs, ((0, n_pad - N), (0, 0)))
        targets = jnp.pad(targets, (0, n_pad - N), constant_values=-1)  # masked in kernel
    t2d = targets.reshape(n_pad, 1)

    kernel = functools.partial(
        _focal_loss2_kernel,
        gamma=float(gamma),
        log_lo=float(math.log(eps)),
        log_hi=float(math.log1p(-eps)),
    )

    partials = pl.pallas_call(
        kernel,
        out_shape=jax.ShapeDtypeStruct((num_tiles, 8, 128), jnp.float32),
        grid_spec=pltpu.PrefetchScalarGridSpec(
            num_scalar_prefetch=0,
            grid=(num_tiles,),
            in_specs=[
                pl.BlockSpec((rt, C), lambda i: (i, 0)),   # logits tile (VMEM)
                pl.BlockSpec((rt, 1), lambda i: (i, 0)),   # targets tile (VMEM)
            ],
            out_specs=pl.BlockSpec((1, 8, 128), lambda i: (i, 0, 0)),   # per-tile partial
        ),
        compiler_params=pltpu.CompilerParams(
            dimension_semantics=("parallel",),   # independent tiles: shard across TensorCores
        ),
    )(inputs, t2d)

    # Tiny final reduction over per-tile partials (done in XLA).
    return jnp.sum(partials[:, 0, 0])


def _focal_loss2_ref(inputs, targets, gamma=0.0, eps=1e-7):
    C = inputs.shape[-1]
    y = jax.nn.one_hot(targets, C, dtype=jnp.float32)
    p = jax.nn.softmax(inputs.astype(jnp.float32), axis=-1)
    p = jnp.clip(p, eps, 1.0 - eps)
    loss = -y * jnp.log(p) * (1.0 - p) ** gamma
    return jnp.sum(loss)


if __name__ == "__main__":
    key = jax.random.PRNGKey(0)
    k1, k2 = jax.random.split(key)

    # U-Net-style small shapes: batch=2, n_classes=4, 15x15 spatial -> flattened (N, C) logits.
    B, H, W, C = 2, 15, 15, 4
    N = B * H * W                        # 450 rows (not a tile multiple: exercises padding/mask)
    gamma, eps = 2.0, 1e-7               # module default gamma=0; 2.0 exercises the focal term

    x = jax.random.normal(k1, (N, C), dtype=jnp.float32)
    t = jax.random.randint(k2, (N,), 0, C, dtype=jnp.int32)

    out = focal_loss2(x, t, gamma=gamma, eps=eps, row_tile=128)  # grid of 4 tiles
    out = jax.block_until_ready(out)

    ref = _focal_loss2_ref(x, t, gamma=gamma, eps=eps)
    assert jnp.allclose(out, ref, rtol=1e-5, atol=1e-4), (out, ref)

    print("KERNEL_OK")
</pallas_src>

<mosaic_0001>
module attributes {stable_mosaic.version = 11 : i64} {
  func.func @_focal_loss2_kernel(%arg0: i32, %arg1: memref<128x4xf32, #tpu.memory_space<vmem>>, %arg2: memref<128x1xi32, #tpu.memory_space<vmem>>, %arg3: memref<1x8x128xf32, #tpu.memory_space<vmem>>) attributes {dimension_semantics = [#tpu.dimension_semantics<parallel>], iteration_bounds = array<i64: 4>, scalar_prefetch = 0 : i64, scratch_operands = 0 : i64, tpu.core_type = #tpu.core_type<tc>, window_params = [{transform_indices = @transform_0, window_bounds = array<i64: 128, 4>}, {transform_indices = @transform_1, window_bounds = array<i64: 128, 1>}, {transform_indices = @transform_2, window_bounds = array<i64: 1, 8, 128>}]} {
    %c0 = arith.constant 0 : index
    %c0_0 = arith.constant 0 : index
    %0 = vector.load %arg1[%c0, %c0_0] : memref<128x4xf32, #tpu.memory_space<vmem>>, vector<128x4xf32>
    %c0_1 = arith.constant 0 : index
    %c0_2 = arith.constant 0 : index
    %1 = vector.load %arg2[%c0_1, %c0_2] : memref<128x1xi32, #tpu.memory_space<vmem>>, vector<128x1xi32>
    %cst = arith.constant dense<0xFF800000> : vector<128xf32>
    %2 = vector.multi_reduction <maximumf>, %0, %cst [1] : vector<128x4xf32> to vector<128xf32>
    %3 = vector.shape_cast %2 : vector<128xf32> to vector<128x1xf32>
    %4 = vector.broadcast %3 : vector<128x1xf32> to vector<128x4xf32>
    %5 = arith.subf %0, %4 : vector<128x4xf32>
    %6 = math.exp %5 : vector<128x4xf32>
    %cst_3 = arith.constant dense<0.000000e+00> : vector<128xf32>
    %7 = vector.multi_reduction <add>, %6, %cst_3 [1] : vector<128x4xf32> to vector<128xf32>
    %8 = vector.shape_cast %7 : vector<128xf32> to vector<128x1xf32>
    %9 = math.log %8 : vector<128x1xf32>
    %10 = arith.addf %3, %9 : vector<128x1xf32>
    %11 = tpu.iota {dimensions = array<i32: 1>} : vector<128x4xi32>
    %12 = vector.broadcast %1 : vector<128x1xi32> to vector<128x4xi32>
    %13 = arith.cmpi eq, %11, %12 : vector<128x4xi32>
    %cst_4 = arith.constant 0.000000e+00 : f32
    %14 = vector.broadcast %cst_4 : f32 to vector<128x4xf32>
    %15 = arith.select %13, %0, %14 : vector<128x4xi1>, vector<128x4xf32>
    %cst_5 = arith.constant dense<0.000000e+00> : vector<128xf32>
    %16 = vector.multi_reduction <add>, %15, %cst_5 [1] : vector<128x4xf32> to vector<128xf32>
    %17 = vector.shape_cast %16 : vector<128xf32> to vector<128x1xf32>
    %18 = arith.subf %17, %10 : vector<128x1xf32>
    %cst_6 = arith.constant -16.1180954 : f32
    %cst_7 = arith.constant -1.00000008E-7 : f32
    %19 = vector.broadcast %cst_6 : f32 to vector<128x1xf32>
    %20 = arith.maximumf %19, %18 : vector<128x1xf32>
    %21 = vector.broadcast %cst_7 : f32 to vector<128x1xf32>
    %22 = arith.minimumf %21, %20 : vector<128x1xf32>
    %23 = math.exp %22 : vector<128x1xf32>
    %cst_8 = arith.constant 1.000000e+00 : f32
    %24 = vector.broadcast %cst_8 : f32 to vector<128x1xf32>
    %25 = arith.subf %24, %23 : vector<128x1xf32>
    %26 = arith.mulf %25, %25 : vector<128x1xf32>
    %cst_9 = arith.constant 0.000000e+00 : f32
    %27 = vector.broadcast %cst_9 : f32 to vector<128x1xf32>
    %28 = arith.subf %27, %22 : vector<128x1xf32>
    %29 = arith.mulf %28, %26 : vector<128x1xf32>
    %c0_i32 = arith.constant 0 : i32
    %30 = vector.broadcast %c0_i32 : i32 to vector<128x1xi32>
    %31 = arith.cmpi sge, %1, %30 : vector<128x1xi32>
    %cst_10 = arith.constant 0.000000e+00 : f32
    %32 = vector.broadcast %cst_10 : f32 to vector<128x1xf32>
    %33 = arith.select %31, %29, %32 : vector<128x1xi1>, vector<128x1xf32>
    %34 = vector.shape_cast %33 : vector<128x1xf32> to vector<1x128x1xf32>
    %cst_11 = arith.constant dense<0.000000e+00> : vector<1xf32>
    %35 = vector.multi_reduction <add>, %34, %cst_11 [1, 2] : vector<1x128x1xf32> to vector<1xf32>
    %36 = vector.shape_cast %35 : vector<1xf32> to vector<1x1x1xf32>
    %37 = vector.extract %36[0, 0, 0] : f32 from vector<1x1x1xf32>
    %38 = vector.broadcast %37 : f32 to vector<1x8x128xf32>
    %c0_12 = arith.constant 0 : index
    %c0_13 = arith.constant 0 : index
    %c0_14 = arith.constant 0 : index
    %39 = vector.load %arg3[%c0_12, %c0_13, %c0_14] : memref<1x8x128xf32, #tpu.memory_space<vmem>>, vector<1x8x128xf32>
    tpu.vector_store %arg3[%c0_12, %c0_13, %c0_14], %38 {strides = array<i32>} : memref<1x8x128xf32, #tpu.memory_space<vmem>>, vector<1x8x128xf32>,
    return
  }
  func.func @transform_0(%arg0: i32) -> (i32, i32) {
    %c0_i32 = arith.constant 0 : i32
    %c0_i32_0 = arith.constant 0 : i32
    return %arg0, %c0_i32 : i32, i32
  }
  func.func @transform_1(%arg0: i32) -> (i32, i32) {
    %c0_i32 = arith.constant 0 : i32
    %c0_i32_0 = arith.constant 0 : i32
    return %arg0, %c0_i32 : i32, i32
  }
  func.func @transform_2(%arg0: i32) -> (i32, i32, i32) {
    %c0_i32 = arith.constant 0 : i32
    %c0_i32_0 = arith.constant 0 : i32
    %c0_i32_1 = arith.constant 0 : i32
    return %arg0, %c0_i32, %c0_i32_0 : i32, i32, i32
  }
}

</mosaic_0001>

<bundles_post_ra>
// kernel: tpu_custom_call.1
= control target key start
LH: loop header
LB: loop body
LE: loop exit
PB: predicated region body
PF: predicated region fallthrough
CT: control target
= control target key end

     0   :  { %7 = vsyncpa [#allocation3], 0  ;;  %s1567_s0 = inlined_call_operand.vmem [shape: f32[512,4], index: 0, kind: input, shape index: {}]   ;;  %s1568_s1 = inlined_call_operand.vmem [shape: s32[512,1], index: 1, kind: input, shape index: {}]   ;;  %s1569_s2 = inlined_call_operand.hbm [shape: f32[4,8,128], index: 2, kind: output, shape index: {}]  }
   0x1   :  { %9 = vsyncpa [#allocation3 + $0x1], 0  ;;  %s1058_s9 = smov 0   ;;  %s1060_s10 = smov 0  }
   0x2   :  { %s1062_s11 = smov 0   ;;  %s1064_s12 = smov 0  }
   0x3 LB: > { %s1079_s13 = sadd.s32 4294967295, %s1039_s12   ;;  %s825_s14 = sadd.s32 4294967294, %s1039_s12   ;;  %s1039_s12 = sphi %s1064_s12, %s1575_s12   ;;  %s1035_s11 = sphi %s1062_s11, %s1574_s11   ;;  %s1031_s10 = sphi %s1060_s10, %s1573_s10   ;;  %s1027_s9 = sphi %s1058_s9, %s1572_s9  }
   0x4   : > { %s1083_s15 = sadd.s32 1, %s1039_s12   ;;  %s74_s16 = sadd.s32 1, %s1035_s11 }
   0x5   : > { %s71_s17 = ssub.s32 %s1039_s12, %s1083_s15  ;;  %p84_p0 = scmp.ne.s32.totalorder %s1035_s11, %s1031_s10 }
   0x6   : > { %p72_p1 = scmp.eq.s32.totalorder %s71_s17, 0  ;;  %p85_p2 = scmp.eq.s32.totalorder %s1079_s13, 3 }
   0x7   : > { %p90_p3 = scmp.ne.s32.totalorder %s1031_s10, %s1027_s9  ;;  %p91_p4 = scmp.eq.s32.totalorder %s825_s14, 3 }
   0x8   : > { %s1094_s18 = scalar_select %p72_p1, %s1035_s11, %s74_s16  }
   0x9   : > { %p1096_p5 = por %p85_p2, %p84_p0  ;;  %p1100_p6 = por %p91_p4, %p90_p3 }
   0xa   : > { %p828_p7 = scmp.ge.s32.totalorder %s1039_s12, 1  ;;  %p127_p8 = scmp.lt.s32.totalorder %s1039_s12, 5 }
   0xc   : > { %p128_p9 = pnand %p828_p7, %p127_p8 }
   0xd   : > { %s830_s21 = sshll.u32 (!%p128_p9), %s1079_s13, 4  ;;  %s151_s29 = sand.u32 (!%p128_p9), 1, %s1031_s10  }
   0xe   : > { %131 = sbr.rel (%p128_p9) target bundleno = 652 (0x28c), region = 28  ;;  %p155_p10 = scmp.lt.s32.totalorder (!%p128_p9), %s830_s21, 63 }
   0xf   : > { %s829_s30 = sshll.u32 (!%p128_p9), %s151_s29, 3  ;;  %s835_s5 = sshll.u32 (!%p128_p9), %s1079_s13, 7 }
  0x10   : > { %s153_s3 = scalar_lea.vmem (!%p128_p9), [#allocation2], %s829_s30  ;;  %s752_s14 = scalar_lea.hbm (!%p128_p9), %s1569_s2, %s835_s5 }
  0x11   : > { %s754_s4 = sshll.u32 (!%p128_p9), %s153_s3, 4  ;;  %s741_s16 = scalar_lea.sflag (!%p128_p9), [#allocation3], %s151_s29  ;;  %s1529_s4 = int_to_ptr.vmem [resolvable:$true] %s754_s4 }
  0x12   : > { %s979_s17 = scalar_lea.vmem (!%p128_p9), %s1529_s4, 128 }
  0x13   : > { %v1041_v0 = vmov 0   ;;  %s1577_s21 = smov (!%p155_p10, %s830_s21), 63  ;;  %vm198_vm0 = vcmask 31744   ;;  %p980_p11 = scmp.ne.s32.totalorder %s1529_s4, %s979_s17 }
  0x14   : > { %881 = vset.pattern.permute.xlu1 %v1041_v0  ;;  %880 = vset.pattern.permute.xlu0 %v1041_v0  ;;  %s831_s22 = sshll.u32 %s1577_s21, 3  ;;  %s1042_s21 = smov [#allocation2]  }
  0x15   : > { %s1115_s25 = scalar_lea.vmem %s1567_s0, %s831_s22  ;;  %s1202_s28 = scalar_lea.vmem %s1568_s1, %s831_s22 }
  0x16   : > { %v1118_v1 = vld [vmem:[%s1115_s25 + $0x10] sm:$0xff]  ;;  %v1121_v2 = vld [vmem:[%s1115_s25] sm:$0xff]  ;;  %v1124_v3 = vld [vmem:[%s1115_s25 + $0x18] sm:$0xff]  ;;  %p981_p12 = pnand %p980_p11, %p1096_p5  ;;  %s983_s13 = sshll.u32 %s1042_s21, 4  ;;  %s984_s13 = int_to_ptr.vmem [resolvable:$false] %s983_s13 }
  0x17   : > { %v205_v4 = vsel %vm198_vm0, %v1118_v1, -inf  ;;  %v199_v5 = vsel %vm198_vm0, %v1121_v2, -inf  ;;  %v1131_v6 = vld [vmem:[%s1115_s25 + $0x8] sm:$0xff]  ;;  %v208_v7 = vsel %vm198_vm0, %v1124_v3, -inf  ;;  %v1141_v10 = vld [vmem:[%s1115_s25 + $0x20] sm:$0xff]  ;;  %v1148_v13 = vld [vmem:[%s1115_s25 + $0x38] sm:$0xff]  ;;  %p986_p0 = scmp.lt.s32.totalorder %s1529_s4, %s984_s13 }
  0x18   : > { %206 = vmax.xlane.f32.xlu1 %v205_v4  ;;  %200 = vmax.xlane.f32.xlu0 %v199_v5  ;;  %v202_v8 = vsel %vm198_vm0, %v1131_v6, -inf  ;;  %v1138_v9 = vld [vmem:[%s1115_s25 + $0x28] sm:$0xff]  ;;  %v211_v12 = vsel %vm198_vm0, %v1141_v10, -inf  ;;  %v1151_v14 = vld [vmem:[%s1115_s25 + $0x30] sm:$0xff]  ;;  %v220_v15 = vsel %vm198_vm0, %v1148_v13, -inf  ;;  %v1161_v18 = vld [vmem:[%s1115_s25 + $0x40] sm:$0xff]  ;;  %v391_v5 = vlaneseq  ;;  %p982_p13 = pneg %p981_p12 }
  0x19   : > { %v214_v11 = vsel %vm198_vm0, %v1138_v9, -inf  ;;  %v217_v16 = vsel %vm198_vm0, %v1151_v14, -inf  ;;  %v1158_v17 = vld [vmem:[%s1115_s25 + $0x48] sm:$0xff]  ;;  %v223_v20 = vsel %vm198_vm0, %v1161_v18, -inf  ;;  %v1168_v21 = vld [vmem:[%s1115_s25 + $0x58] sm:$0xff]  ;;  %v1171_v22 = vld [vmem:[%s1115_s25 + $0x50] sm:$0xff] }
  0x1a   : > { %v226_v19 = vsel %vm198_vm0, %v1158_v17, -inf  ;;  %v232_v23 = vsel %vm198_vm0, %v1168_v21, -inf  ;;  %v229_v24 = vsel %vm198_vm0, %v1171_v22, -inf  ;;  %v1178_v25 = vld [vmem:[%s1115_s25 + $0x68] sm:$0xff]  ;;  %v1181_v26 = vld [vmem:[%s1115_s25 + $0x60] sm:$0xff]  ;;  %v1188_v29 = vld [vmem:[%s1115_s25 + $0x78] sm:$0xff] }
  0x1b   : > { %v238_v27 = vsel %vm198_vm0, %v1178_v25, -inf  ;;  %v235_v28 = vsel %vm198_vm0, %v1181_v26, -inf  ;;  %v1191_v30 = vld [vmem:[%s1115_s25 + $0x70] sm:$0xff]  ;;  %v244_v31 = vsel %vm198_vm0, %v1188_v29, -inf  ;;  %v1205_v33 = vld [vmem:[%s1202_s28 + $0x8] sm:$0xff]  ;;  %v1212_v35 = vld [vmem:[%s1202_s28] sm:$0xff] }
  0x1c   : > { %209 = vmax.xlane.f32.xlu1 %v208_v7  ;;  %203 = vmax.xlane.f32.xlu0 %v202_v8  ;;  %v241_v32 = vsel %vm198_vm0, %v1191_v30, -inf  ;;  %v1209_v34 = vld [vmem:[%s1202_s28 + $0x10] sm:$0xff]  ;;  %v1217_v36 = vld [vmem:[%s1202_s28 + $0x18] sm:$0xff]  ;;  %v1220_v37 = vld [vmem:[%s1202_s28 + $0x48] sm:$0xff]  ;;  %s985_s22 = scalar_lea.vmem %s984_s13, 256 }
  0x1d   : > { %v1225_v38 = vld [vmem:[%s1202_s28 + $0x20] sm:$0xff]  ;;  %v1228_v39 = vld [vmem:[%s1202_s28 + $0x58] sm:$0xff]  ;;  %v1233_v40 = vld [vmem:[%s1202_s28 + $0x28] sm:$0xff]  ;;  %p987_p1 = scmp.lt.s32.totalorder %s985_s22, %s979_s17 }
  0x1e   : > { %v1236_v41 = vld [vmem:[%s1202_s28 + $0x68] sm:$0xff]  ;;  %v1241_v42 = vld [vmem:[%s1202_s28 + $0x30] sm:$0xff]  ;;  %v197_v43 = vld [vmem:[%s1202_s28 + $0x78] sm:$0xff] }
  0x1f   : > { %v1246_v44 = vld [vmem:[%s1202_s28 + $0x38] sm:$0xff]  ;;  %v1250_v45 = vld [vmem:[%s1202_s28 + $0x40] sm:$0xff]  ;;  %v1254_v46 = vld [vmem:[%s1202_s28 + $0x50] sm:$0xff]  ;;  %p988_p2 = por %p987_p1, %p986_p0 }
  0x20   : > { %215 = vmax.xlane.f32.xlu1 %v214_v11  ;;  %212 = vmax.xlane.f32.xlu0 %v211_v12  ;;  %v1258_v47 = vld [vmem:[%s1202_s28 + $0x60] sm:$0xff]  ;;  %v1262_v48 = vld [vmem:[%s1202_s28 + $0x70] sm:$0xff] }
  0x21   : > { %p989_p3 = pnand %p988_p2, %p982_p13 }
  0x24   : > { %221 = vmax.xlane.f32.xlu1 %v220_v15  ;;  %218 = vmax.xlane.f32.xlu0 %v217_v16 }
  0x28   : > { %227 = vmax.xlane.f32.xlu1 %v226_v19  ;;  %224 = vmax.xlane.f32.xlu0 %v223_v20  ;;  %v1307_v20 = vand.u32 127, %v391_v5 }
  0x2c   : > { %233 = vmax.xlane.f32.xlu1 %v232_v23  ;;  %230 = vmax.xlane.f32.xlu0 %v229_v24 }
  0x30   : > { %239 = vmax.xlane.f32.xlu1 %v238_v27  ;;  %236 = vmax.xlane.f32.xlu0 %v235_v28 }
  0x34   : > { %245 = vmax.xlane.f32.xlu1 %v244_v31  ;;  %242 = vmax.xlane.f32.xlu0 %v241_v32 }
  0x45   : > { %397 = vperm.xlu1 %881, %v1205_v33  }
  0x49   : > { %400 = vperm.xlu1 %881, %v1209_v34  }
  0x4a   : > { %394 = vperm.xlu0 %880, %v1212_v35  }
  0x4d   : > { %403 = vperm.xlu1 %881, %v1217_v36  }
  0x4e   : > { %421 = vperm.xlu0 %880, %v1220_v37  }
  0x51   : > { %406 = vperm.xlu1 %881, %v1225_v38  }
  0x52   : > { %427 = vperm.xlu0 %880, %v1228_v39  }
  0x55   : > { %409 = vperm.xlu1 %881, %v1233_v40  }
  0x56   : > { %433 = vperm.xlu0 %880, %v1236_v41  }
  0x59   : > { %412 = vperm.xlu1 %881, %v1241_v42  }
  0x5a   : > { %439 = vperm.xlu0 %880, %v197_v43  }
  0x5d   : > { %415 = vperm.xlu1 %881, %v1246_v44  }
  0x61   : > { %418 = vperm.xlu1 %881, %v1250_v45  }
  0x65   : > { %424 = vperm.xlu1 %881, %v1254_v46  }
  0x69   : > { %430 = vperm.xlu1 %881, %v1258_v47  }
  0x6d   : > { %436 = vperm.xlu1 %881, %v1262_v48  }
  0xa1   : > { %v1265_v49 = vpop.xlane.xlu1 %206  ;;  %v1267_v50 = vpop.xlane.xlu0 %200 }
  0xa2   : > { %v247_v59 = vsub.f32 %v1121_v2, %v1267_v50  ;;  %v249_v7 = vsub.f32 %v1118_v1, %v1265_v49 }
  0xa4   : > { %v263_v62 = vmul.f32 1.442695, %v247_v59  ;;  %v267_v23 = vmul.f32 1.442695, %v249_v7 }
  0xa5   : > { %v1269_v51 = vpop.xlane.xlu1 %209  ;;  %v1271_v52 = vpop.xlane.xlu0 %203 }
  0xa6   : > { %v250_v63 = vsub.f32 %v1124_v3, %v1269_v51  ;;  %v248_v0 = vsub.f32 %v1131_v6, %v1271_v52  ;;  %882 = vpow2.f32 %v263_v62 }
  0xa8   : > { %v269_v8 = vmul.f32 1.442695, %v250_v63  ;;  %v265_v12 = vmul.f32 1.442695, %v248_v0 }
  0xa9   : > { %v1273_v53 = vpop.xlane.xlu1 %215  ;;  %v1275_v54 = vpop.xlane.xlu0 %212 }
  0xaa   : > { %v252_v15 = vsub.f32 %v1138_v9, %v1273_v53  ;;  %v251_v19 = vsub.f32 %v1141_v10, %v1275_v54  ;;  %884 = vpow2.f32 %v269_v8 }
  0xab   : > { %886 = vpow2.f32 %v265_v12 }
  0xac   : > { %v273_v27 = vmul.f32 1.442695, %v252_v15  ;;  %v271_v32 = vmul.f32 1.442695, %v251_v19  ;;  %888 = vpow2.f32 %v267_v23 }
  0xad   : > { %v1277_v55 = vpop.xlane.xlu1 %221  ;;  %v1279_v56 = vpop.xlane.xlu0 %218 }
  0xae   : > { %v254_v24 = vsub.f32 %v1148_v13, %v1277_v55  ;;  %v253_v43 = vsub.f32 %v1151_v14, %v1279_v56  ;;  %890 = vpow2.f32 %v273_v27 }
  0xaf   : > { %892 = vpow2.f32 %v271_v32 }
  0xb0   : > { %v277_v59 = vmul.f32 1.442695, %v254_v24  ;;  %v275_v8 = vmul.f32 1.442695, %v253_v43 }
  0xb1   : > { %v1281_v57 = vpop.xlane.xlu1 %227  ;;  %v1283_v58 = vpop.xlane.xlu0 %224 }
  0xb2   : > { %v256_v63 = vsub.f32 %v1158_v17, %v1281_v57  ;;  %894 = vpow2.f32 %v277_v59  ;;  %v255_v12 = vsub.f32 %v1161_v18, %v1283_v58 }
  0xb3   : > { %v883_v19 = vpop.eup %882  ;;  %896 = vpow2.f32 %v275_v8 }
  0xb4   : > { %v281_v23 = vmul.f32 1.442695, %v256_v63  ;;  %v279_v43 = vmul.f32 1.442695, %v255_v12  ;;  %v295_v59 = vsel %vm198_vm0, %v883_v19, 0.0 }
  0xb5   : > { %v1287_v60 = vpop.xlane.xlu1 %233  ;;  %v1289_v61 = vpop.xlane.xlu0 %230 }
  0xb6   : > { %v258_v24 = vsub.f32 %v1168_v21, %v1287_v60  ;;  %898 = vpow2.f32 %v281_v23 }
  0xb7   : > { %900 = vpow2.f32 %v279_v43 }
  0xb8   : > { %v285_v63 = vmul.f32 1.442695, %v258_v24 }
  0xb9   : > { %v1295_v4 = vpop.xlane.xlu1 %239  ;;  %v1299_v11 = vpop.xlane.xlu0 %236 }
  0xba   : > { %902 = vpow2.f32 %v285_v63 }
  0xbd   : > { %v1303_v16 = vpop.xlane.xlu1 %245  ;;  %v1311_v28 = vpop.xlane.xlu0 %242 }
  0xc1   : > { %v398_v31 = vpop.permute.xlu1 %397 }
  0xc2   : > { %vm442_vm1 = vcmp.eq.s32.totalorder %v1307_v20, %v398_v31 }
  0xc3   : > { %v458_v62 = vsel %vm442_vm1, %v1131_v6, 0.0 }
  0xc4   : > { %v476_v0 = vsel %vm198_vm0, %v458_v62, 0.0  ;;  %v885_v62 = vpop.eup %884 }
  0xc5   : > { %v401_v5 = vpop.permute.xlu1 %400  ;;  %477 = vadd.xlane.f32.xlu0 %v476_v0  ;;  %v395_v7 = vpop.permute.xlu0 %394  ;;  %v259_v0 = vsub.f32 %v1181_v26, %v1299_v11 }
  0xc6   : > { %vm443_vm2 = vcmp.eq.s32.totalorder %v1307_v20, %v401_v5  ;;  %vm441_vm3 = vcmp.eq.s32.totalorder %v1307_v20, %v395_v7  ;;  %v887_v7 = vpop.eup %886 }
  0xc7   : > { %v459_v6 = vsel %vm443_vm2, %v1118_v1, 0.0  ;;  %v457_v15 = vsel %vm441_vm3, %v1121_v2, 0.0  ;;  %v257_v1 = vsub.f32 %v1171_v22, %v1289_v61  ;;  %v287_v19 = vmul.f32 1.442695, %v259_v0 }
  0xc8   : > { %v479_v27 = vsel %vm198_vm0, %v459_v6, 0.0  ;;  %v473_v31 = vsel %vm198_vm0, %v457_v15, 0.0  ;;  %v304_v6 = vsel %vm198_vm0, %v885_v62, 0.0  ;;  %v889_v15 = vpop.eup %888  ;;  %v298_v23 = vsel %vm198_vm0, %v887_v7, 0.0 }
  0xc9   : > { %v404_v32 = vpop.permute.xlu1 %403  ;;  %480 = vadd.xlane.f32.xlu0 %v479_v27  ;;  %474 = vadd.xlane.f32.xlu1 %v473_v31  ;;  %v283_v12 = vmul.f32 1.442695, %v257_v1  ;;  %v891_v24 = vpop.eup %890  ;;  %v262_v0 = vsub.f32 %v1188_v29, %v1303_v16  ;;  %vm666_vm2 = vcmp.ge.s32.totalorder %v1205_v33, 0  ;;  %vm697_vm3 = vcmask 7168  }
  0xca   : > { %vm444_vm4 = vcmp.eq.s32.totalorder %v1307_v20, %v404_v32  ;;  %v893_v27 = vpop.eup %892  ;;  %v301_v32 = vsel %vm198_vm0, %v889_v15, 0.0 }
  0xcb   : > { %v460_v2 = vsel %vm444_vm4, %v1124_v3, 0.0  ;;  %v260_v3 = vsub.f32 %v1178_v25, %v1295_v4  ;;  %904 = vpow2.f32 %v283_v12  ;;  %v895_v43 = vpop.eup %894  ;;  %v307_v63 = vsel %vm198_vm0, %v893_v27, 0.0 }
  0xcc   : > { %v482_v5 = vsel %vm198_vm0, %v460_v2, 0.0  ;;  %906 = vpow2.f32 %v287_v19  ;;  %v261_v2 = vsub.f32 %v1191_v30, %v1311_v28  ;;  %v897_v62 = vpop.eup %896  ;;  %v316_v7 = vsel %vm198_vm0, %v895_v43, 0.0 }
  0xcd   : > { %v407_v8 = vpop.permute.xlu1 %406  ;;  %483 = vadd.xlane.f32.xlu0 %v482_v5  ;;  %296 = vadd.xlane.f32.xlu1 %v295_v59  ;;  %v289_v1 = vmul.f32 1.442695, %v260_v3  ;;  %v310_v59 = vsel %vm198_vm0, %v891_v24, 0.0  ;;  %v899_v12 = vpop.eup %898  ;;  %v293_v3 = vmul.f32 1.442695, %v262_v0  ;;  %v313_v19 = vsel %vm198_vm0, %v897_v62, 0.0 }
  0xce   : > { %v291_v5 = vmul.f32 1.442695, %v261_v2  ;;  %v901_v15 = vpop.eup %900  ;;  %vm445_vm5 = vcmp.eq.s32.totalorder %v1307_v20, %v407_v8  ;;  %vm668_vm4 = vcmp.ge.s32.totalorder %v1217_v36, 0 }
  0xcf   : > { %908 = vpow2.f32 %v289_v1  ;;  %v903_v24 = vpop.eup %902  ;;  %v319_v1 = vsel %vm198_vm0, %v901_v15, 0.0 }
  0xd0   : > { %910 = vpow2.f32 %v291_v5  ;;  %v328_v43 = vsel %vm198_vm0, %v903_v24, 0.0  ;;  %v461_v5 = vsel %vm445_vm5, %v1141_v10, 0.0  ;;  %vm667_vm5 = vcmp.ge.s32.totalorder %v1209_v34, 0 }
  0xd1   : > { %299 = vadd.xlane.f32.xlu0 %v298_v23  ;;  %305 = vadd.xlane.f32.xlu1 %v304_v6  ;;  %v410_v31 = vpop.permute.xlu1 %409  ;;  %v322_v23 = vsel %vm198_vm0, %v899_v12, 0.0  ;;  %912 = vpow2.f32 %v293_v3  ;;  %v422_v3 = vpop.permute.xlu0 %421 }
  0xd2   : > { %vm446_vm6 = vcmp.eq.s32.totalorder %v1307_v20, %v410_v31  ;;  %vm450_vm10 = vcmp.eq.s32.totalorder %v1307_v20, %v422_v3 }
  0xd3   : > { %v462_v8 = vsel %vm446_vm6, %v1138_v9, 0.0  ;;  %vm669_vm6 = vcmp.ge.s32.totalorder %v1225_v38, 0 }
  0xd5   : > { %302 = vadd.xlane.f32.xlu0 %v301_v32  ;;  %311 = vadd.xlane.f32.xlu1 %v310_v59  ;;  %v413_v6 = vpop.permute.xlu1 %412 }
  0xd6   : > { %vm447_vm7 = vcmp.eq.s32.totalorder %v1307_v20, %v413_v6 }
  0xd7   : > { %v463_v31 = vsel %vm447_vm7, %v1151_v14, 0.0  ;;  %vm670_vm7 = vcmp.ge.s32.totalorder %v1233_v40, 0 }
  0xd8   : > { %v905_v32 = vpop.eup %904 }
  0xd9   : > { %308 = vadd.xlane.f32.xlu0 %v307_v63  ;;  %317 = vadd.xlane.f32.xlu1 %v316_v7  ;;  %v416_v27 = vpop.permute.xlu1 %415  ;;  %v907_v2 = vpop.eup %906  ;;  %v325_v59 = vsel %vm198_vm0, %v905_v32, 0.0  ;;  %v485_v7 = vsel %vm198_vm0, %v461_v5, 0.0 }
  0xda   : > { %v331_v62 = vsel %vm198_vm0, %v907_v2, 0.0  ;;  %vm448_vm8 = vcmp.eq.s32.totalorder %v1307_v20, %v416_v27  ;;  %v428_v32 = vpop.permute.xlu0 %427 }
  0xdb   : > { %v464_v2 = vsel %vm448_vm8, %v1148_v13, 0.0  ;;  %vm452_vm12 = vcmp.eq.s32.totalorder %v1307_v20, %v428_v32  ;;  %vm671_vm8 = vcmp.ge.s32.totalorder %v1241_v42, 0 }
  0xdc   : > { %v909_v63 = vpop.eup %908  ;;  %v494_v27 = vsel %vm198_vm0, %v464_v2, 0.0 }
  0xdd   : > { %314 = vadd.xlane.f32.xlu0 %v313_v19  ;;  %323 = vadd.xlane.f32.xlu1 %v322_v23  ;;  %v419_v0 = vpop.permute.xlu1 %418  ;;  %v334_v12 = vsel %vm198_vm0, %v909_v63, 0.0  ;;  %v911_v15 = vpop.eup %910  ;;  %v488_v23 = vsel %vm198_vm0, %v462_v8, 0.0  ;;  %v466_v63 = vsel %vm450_vm10, %v1158_v17, 0.0  ;;  %vm673_vm10 = vcmp.ge.s32.totalorder %v1250_v45, 0 }
  0xde   : > { %v337_v24 = vsel %vm198_vm0, %v911_v15, 0.0  ;;  %v913_v10 = vpop.eup %912  ;;  %vm449_vm9 = vcmp.eq.s32.totalorder %v1307_v20, %v419_v0  ;;  %v500_v0 = vsel %vm198_vm0, %v466_v63, 0.0 }
  0xdf   : > { %v340_v9 = vsel %vm198_vm0, %v913_v10, 0.0 }
  0xe1   : > { %320 = vadd.xlane.f32.xlu0 %v319_v1  ;;  %329 = vadd.xlane.f32.xlu1 %v328_v43  ;;  %v425_v19 = vpop.permute.xlu1 %424  ;;  %v491_v1 = vsel %vm198_vm0, %v463_v31, 0.0  ;;  %v465_v43 = vsel %vm449_vm9, %v1161_v18, 0.0  ;;  %vm672_vm9 = vcmp.ge.s32.totalorder %v1246_v44, 0 }
  0xe2   : > { %vm451_vm11 = vcmp.eq.s32.totalorder %v1307_v20, %v425_v19  ;;  %v497_v14 = vsel %vm198_vm0, %v465_v43, 0.0 }
  0xe5   : > { %326 = vadd.xlane.f32.xlu0 %v325_v59  ;;  %332 = vadd.xlane.f32.xlu1 %v331_v62  ;;  %v431_v6 = vpop.permute.xlu1 %430  ;;  %v434_v59 = vpop.permute.xlu0 %433  ;;  %v467_v62 = vsel %vm451_vm11, %v1171_v22, 0.0  ;;  %vm674_vm11 = vcmp.ge.s32.totalorder %v1220_v37, 0 }
  0xe6   : > { %vm453_vm13 = vcmp.eq.s32.totalorder %v1307_v20, %v431_v6  ;;  %v503_v18 = vsel %vm198_vm0, %v467_v62, 0.0  ;;  %vm454_vm14 = vcmp.eq.s32.totalorder %v1307_v20, %v434_v59 }
  0xe7   : > { %v469_v5 = vsel %vm453_vm13, %v1181_v26, 0.0  ;;  %v470_v3 = vsel %vm454_vm14, %v1178_v25, 0.0  ;;  %vm676_vm13 = vcmp.ge.s32.totalorder %v1228_v39, 0  ;;  %vm677_vm14 = vcmp.ge.s32.totalorder %v1258_v47, 0 }
  0xe8   : > { %v509_v22 = vsel %vm198_vm0, %v469_v5, 0.0 }
  0xe9   : > { %486 = vadd.xlane.f32.xlu0 %v485_v7  ;;  %335 = vadd.xlane.f32.xlu1 %v334_v12  ;;  %v437_v13 = vpop.permute.xlu1 %436  ;;  %v468_v7 = vsel %vm452_vm12, %v1168_v21, 0.0  ;;  %v440_v17 = vpop.permute.xlu0 %439  ;;  %v512_v21 = vsel %vm198_vm0, %v470_v3, 0.0  ;;  %vm675_vm12 = vcmp.ge.s32.totalorder %v1254_v46, 0 }
  0xea   : > { %vm455_vm15 = vcmp.eq.s32.totalorder %v1307_v20, %v437_v13  ;;  %v506_v12 = vsel %vm198_vm0, %v468_v7, 0.0  ;;  %vm456_vm1 = vcmp.eq.s32.totalorder %v1307_v20, %v440_v17 }
  0xeb   : > { %v471_v15 = vsel %vm455_vm15, %v1191_v30, 0.0  ;;  %v472_v8 = vsel %vm456_vm1, %v1188_v29, 0.0  ;;  %vm678_vm15 = vcmp.ge.s32.totalorder %v1236_v41, 0  ;;  %vm679_vm1 = vcmp.ge.s32.totalorder %v1262_v48, 0 }
  0xec   : > { %v515_v26 = vsel %vm198_vm0, %v471_v15, 0.0  ;;  %v518_v19 = vsel %vm198_vm0, %v472_v8, 0.0  ;;  %vm665_vm0 = vcmp.ge.s32.totalorder %v1212_v35, 0 }
  0xed   : > { %489 = vadd.xlane.f32.xlu0 %v488_v23  ;;  %338 = vadd.xlane.f32.xlu1 %v337_v24 }
  0xf1   : > { %492 = vadd.xlane.f32.xlu0 %v491_v1  ;;  %341 = vadd.xlane.f32.xlu1 %v340_v9 }
  0xf5   : > { %498 = vadd.xlane.f32.xlu0 %v497_v14  ;;  %495 = vadd.xlane.f32.xlu1 %v494_v27 }
  0xf9   : > { %504 = vadd.xlane.f32.xlu0 %v503_v18  ;;  %501 = vadd.xlane.f32.xlu1 %v500_v0 }
  0xfd   : > { %510 = vadd.xlane.f32.xlu0 %v509_v22  ;;  %507 = vadd.xlane.f32.xlu1 %v506_v12 }
 0x101   : > { %516 = vadd.xlane.f32.xlu0 %v515_v26  ;;  %513 = vadd.xlane.f32.xlu1 %v512_v21 }
 0x105   : > { %519 = vadd.xlane.f32.xlu1 %v518_v19 }
 0x14e   : > { %v478_v23 = vpop.xlane.xlu0 %477 }
 0x152   : > { %v475_v24 = vpop.xlane.xlu1 %474  ;;  %v481_v10 = vpop.xlane.xlu0 %480 }
 0x156   : > { %v297_v31 = vpop.xlane.xlu1 %296  ;;  %v484_v30 = vpop.xlane.xlu0 %483 }
 0x157   : > { %914 = vlog2.f32 %v297_v31 }
 0x15a   : > { %v306_v25 = vpop.xlane.xlu1 %305  ;;  %v300_v32 = vpop.xlane.xlu0 %299 }
 0x15b   : > { %916 = vlog2.f32 %v306_v25 }
 0x15c   : > { %918 = vlog2.f32 %v300_v32 }
 0x15e   : > { %v312_v20 = vpop.xlane.xlu1 %311  ;;  %v303_v1 = vpop.xlane.xlu0 %302 }
 0x15f   : > { %920 = vlog2.f32 %v303_v1 }
 0x160   : > { %922 = vlog2.f32 %v312_v20 }
 0x162   : > { %v318_v9 = vpop.xlane.xlu1 %317  ;;  %v309_v6 = vpop.xlane.xlu0 %308 }
 0x163   : > { %924 = vlog2.f32 %v309_v6 }
 0x164   : > { %v915_v29 = vpop.eup %914 }
 0x165   : > { %v344_v43 = vmul.f32 0.6931472, %v915_v29 }
 0x166   : > { %v324_v2 = vpop.xlane.xlu1 %323  ;;  %v315_v14 = vpop.xlane.xlu0 %314 }
 0x167   : > { %v375_v27 = vadd.f32 %v344_v43, %v1267_v50  ;;  %926 = vlog2.f32 %v315_v14 }
 0x168   : > { %v917_v59 = vpop.eup %916  ;;  %928 = vlog2.f32 %v318_v9 }
 0x169   : > { %v919_v62 = vpop.eup %918  ;;  %v521_v63 = vsub.f32 %v475_v24, %v375_v27  ;;  %v350_v13 = vmul.f32 0.6931472, %v917_v59  ;;  %930 = vlog2.f32 %v324_v2 }
 0x16a   : > { %v346_v18 = vmul.f32 0.6931472, %v919_v62  ;;  %v330_v0 = vpop.xlane.xlu1 %329  ;;  %v321_v5 = vpop.xlane.xlu0 %320 }
 0x16b   : > { %v537_v7 = vmax.f32 %v521_v63, -16.118095  ;;  %v378_v17 = vadd.f32 %v350_v13, %v1269_v51  ;;  %932 = vlog2.f32 %v321_v5 }
 0x16c   : > { %v376_v22 = vadd.f32 %v346_v18, %v1271_v52  ;;  %v921_v12 = vpop.eup %920  ;;  %934 = vlog2.f32 %v330_v0 }
 0x16d   : > { %v553_v15 = vmin.f32 %v537_v7, -1.0000001e-07  ;;  %v524_v3 = vsub.f32 %v484_v30, %v378_v17  ;;  %v923_v50 = vpop.eup %922  ;;  %v348_v21 = vmul.f32 0.6931472, %v921_v12 }
 0x16e   : > { %v522_v26 = vsub.f32 %v478_v23, %v376_v22  ;;  %v333_v8 = vpop.xlane.xlu1 %332  ;;  %v327_v19 = vpop.xlane.xlu0 %326  ;;  %v354_v20 = vmul.f32 0.6931472, %v923_v50 }
 0x16f   : > { %v569_v24 = vmul.f32 1.442695, %v553_v15  ;;  %v1398_v31 = vmax.f32 %v524_v3, -16.118095  ;;  %v377_v51 = vadd.f32 %v348_v21, %v1265_v49  ;;  %936 = vlog2.f32 %v327_v19 }
 0x170   : > { %v1400_v25 = vmax.f32 %v522_v26, -16.118095  ;;  %v925_v32 = vpop.eup %924  ;;  %v380_v27 = vadd.f32 %v354_v20, %v1273_v53 }
 0x171   : > { %938 = vpow2.f32 %v569_v24  ;;  %v556_v52 = vmin.f32 %v1398_v31, -1.0000001e-07  ;;  %v523_v23 = vsub.f32 %v481_v10, %v377_v51  ;;  %v352_v1 = vmul.f32 0.6931472, %v925_v32 }
 0x172   : > { %v554_v30 = vmin.f32 %v1400_v25, -1.0000001e-07  ;;  %940 = vlog2.f32 %v333_v8  ;;  %v336_v9 = vpop.xlane.xlu1 %335  ;;  %v487_v6 = vpop.xlane.xlu0 %486  ;;  %v633_v25 = vsub.f32 0.0, %v553_v15 }
 0x173   : > { %v575_v29 = vmul.f32 1.442695, %v556_v52  ;;  %v539_v2 = vmax.f32 %v523_v23, -16.118095  ;;  %942 = vlog2.f32 %v336_v9  ;;  %v379_v49 = vadd.f32 %v352_v1, %v1275_v54 }
 0x174   : > { %v571_v43 = vmul.f32 1.442695, %v554_v30  ;;  %v927_v14 = vpop.eup %926 }
 0x175   : > { %944 = vpow2.f32 %v575_v29  ;;  %v929_v59 = vpop.eup %928  ;;  %v555_v62 = vmin.f32 %v539_v2, -1.0000001e-07  ;;  %v356_v10 = vmul.f32 0.6931472, %v927_v14  ;;  %v525_v63 = vsub.f32 %v487_v6, %v379_v49 }
 0x176   : > { %946 = vpow2.f32 %v571_v43  ;;  %v339_v13 = vpop.xlane.xlu1 %338  ;;  %v490_v18 = vpop.xlane.xlu0 %489  ;;  %v358_v12 = vmul.f32 0.6931472, %v929_v59 }
 0x177   : > { %v526_v0 = vsub.f32 %v490_v18, %v380_v27  ;;  %v931_v5 = vpop.eup %930  ;;  %v573_v7 = vmul.f32 1.442695, %v555_v62  ;;  %v1409_v17 = vmax.f32 %v525_v63, -16.118095  ;;  %948 = vlog2.f32 %v339_v13 }
 0x178   : > { %v933_v22 = vpop.eup %932  ;;  %v381_v3 = vadd.f32 %v356_v10, %v1279_v56  ;;  %v362_v51 = vmul.f32 0.6931472, %v931_v5  ;;  %v382_v1 = vadd.f32 %v358_v12, %v1277_v55  ;;  %v636_v55 = vsub.f32 0.0, %v556_v52 }
 0x179   : > { %v542_v54 = vmax.f32 %v526_v0, -16.118095  ;;  %950 = vpow2.f32 %v573_v7  ;;  %v360_v53 = vmul.f32 0.6931472, %v933_v22  ;;  %v557_v50 = vmin.f32 %v1409_v17, -1.0000001e-07  ;;  %v935_v8 = vpop.eup %934 }
 0x17a   : > { %v342_v26 = vpop.xlane.xlu1 %341  ;;  %v493_v21 = vpop.xlane.xlu0 %492  ;;  %v366_v6 = vmul.f32 0.6931472, %v935_v8  ;;  %v634_v10 = vsub.f32 0.0, %v554_v30  ;;  %v384_v63 = vadd.f32 %v362_v51, %v1281_v57  ;;  %v635_v0 = vsub.f32 0.0, %v555_v62 }
 0x17b   : > { %v558_v19 = vmin.f32 %v542_v54, -1.0000001e-07  ;;  %v527_v24 = vsub.f32 %v493_v21, %v381_v3  ;;  %v577_v32 = vmul.f32 1.442695, %v557_v50  ;;  %952 = vlog2.f32 %v342_v26 }
 0x17c   : > { %v937_v20 = vpop.eup %936  ;;  %v383_v56 = vadd.f32 %v360_v53, %v1283_v58  ;;  %v386_v52 = vadd.f32 %v366_v6, %v1287_v60 }
 0x17d   : > { %v579_v23 = vmul.f32 1.442695, %v558_v19  ;;  %v364_v29 = vmul.f32 0.6931472, %v937_v20  ;;  %954 = vpow2.f32 %v577_v32  ;;  %v543_v43 = vmax.f32 %v527_v24, -16.118095 }
 0x17e   : > { %v939_v9 = vpop.eup %938  ;;  %v496_v2 = vpop.xlane.xlu1 %495  ;;  %v637_v32 = vsub.f32 0.0, %v557_v50  ;;  %v638_v20 = vsub.f32 0.0, %v558_v19 }
 0x17f   : > { %v499_v49 = vpop.xlane.xlu0 %498  ;;  %v941_v14 = vpop.eup %940  ;;  %v601_v15 = vsub.f32 1.0, %v939_v9  ;;  %956 = vpow2.f32 %v579_v23  ;;  %v528_v27 = vsub.f32 %v496_v2, %v382_v1  ;;  %v559_v58 = vmin.f32 %v543_v43, -1.0000001e-07 }
 0x180   : > { %v529_v59 = vsub.f32 %v499_v49, %v383_v56  ;;  %v943_v13 = vpop.eup %942  ;;  %v368_v22 = vmul.f32 0.6931472, %v941_v14  ;;  %v385_v3 = vadd.f32 %v364_v29, %v1289_v61 }
 0x181   : > { %v617_v18 = vmul.f32 %v601_v15, %v601_v15  ;;  %v544_v5 = vmax.f32 %v528_v27, -16.118095  ;;  %v581_v12 = vmul.f32 1.442695, %v559_v58  ;;  %v370_v56 = vmul.f32 0.6931472, %v943_v13 }
 0x182   : > { %v1420_v7 = vmax.f32 %v529_v59, -16.118095  ;;  %v945_v17 = vpop.eup %944  ;;  %v502_v54 = vpop.xlane.xlu1 %501  ;;  %v1433_v43 = vsub.f32 0.0, %v559_v58 }
 0x183   : > { %v505_v31 = vpop.xlane.xlu0 %504  ;;  %v947_v30 = vpop.eup %946  ;;  %v649_v57 = vmul.f32 %v633_v25, %v617_v18  ;;  %v604_v53 = vsub.f32 1.0, %v945_v17  ;;  %v560_v62 = vmin.f32 %v544_v5, -1.0000001e-07  ;;  %958 = vpow2.f32 %v581_v12 }
 0x184   : > { %v561_v26 = vmin.f32 %v1420_v7, -1.0000001e-07  ;;  %v602_v21 = vsub.f32 1.0, %v947_v30  ;;  %v530_v8 = vsub.f32 %v502_v54, %v384_v63  ;;  %v531_v24 = vsub.f32 %v505_v31, %v385_v3  ;;  %v949_v61 = vpop.eup %948 }
 0x185   : > { %v620_v51 = vmul.f32 %v604_v53, %v604_v53  ;;  %v583_v23 = vmul.f32 1.442695, %v560_v62  ;;  %v387_v25 = vadd.f32 %v368_v22, %v1299_v11  ;;  %v681_v29 = vsel %vm665_vm0, %v649_v57, 0.0 }
 0x186   : > { %v618_v1 = vmul.f32 %v602_v21, %v602_v21  ;;  %v585_v60 = vmul.f32 1.442695, %v561_v26  ;;  %v508_v9 = vpop.xlane.xlu1 %507  ;;  %v951_v6 = vpop.eup %950  ;;  %v1435_v50 = vmax.f32 %v530_v8, -16.118095  ;;  %v1438_v49 = vmax.f32 %v531_v24, -16.118095 }
 0x187   : > { %960 = vpow2.f32 %v583_v23  ;;  %v603_v2 = vsub.f32 1.0, %v951_v6  ;;  %v652_v14 = vmul.f32 %v636_v55, %v620_v51  ;;  %v372_v11 = vmul.f32 0.6931472, %v949_v61  ;;  %v511_v18 = vpop.xlane.xlu0 %510 }
 0x188   : > { %v650_v19 = vmul.f32 %v634_v10, %v618_v1  ;;  %962 = vpow2.f32 %v585_v60  ;;  %v562_v15 = vmin.f32 %v1435_v50, -1.0000001e-07  ;;  %v532_v27 = vsub.f32 %v508_v9, %v386_v52  ;;  %v953_v59 = vpop.eup %952 }
 0x189   : > { %v698_v35 = vsel %vm697_vm3, %v681_v29, 0.0  ;;  %v619_v63 = vmul.f32 %v603_v2, %v603_v2  ;;  %v563_v13 = vmin.f32 %v1438_v49, -1.0000001e-07  ;;  %v1446_v17 = vsub.f32 0.0, %v560_v62 }
 0x18a   : > { %v682_v58 = vsel %vm666_vm2, %v650_v19, 0.0  ;;  %v955_v10 = vpop.eup %954  ;;  %v587_v55 = vmul.f32 1.442695, %v562_v15  ;;  %v1450_v22 = vmax.f32 %v532_v27, -16.118095  ;;  %v684_v52 = vsel %vm668_vm4, %v652_v14, 0.0  ;;  %v514_v21 = vpop.xlane.xlu1 %513 }
 0x18b   : > { %v699_v5 = vsel %vm697_vm3, %v682_v58, 0.0  ;;  %v651_v54 = vmul.f32 %v635_v0, %v619_v63  ;;  %v605_v31 = vsub.f32 1.0, %v955_v10  ;;  %v589_v33 = vmul.f32 1.442695, %v563_v13  ;;  %v517_v9 = vpop.xlane.xlu0 %516 }
 0x18c   : > { %v957_v12 = vpop.eup %956  ;;  %v700_v3 = vadd.f32 %v699_v5, %v698_v35  ;;  %964 = vpow2.f32 %v587_v55  ;;  %v564_v57 = vmin.f32 %v1450_v22, -1.0000001e-07  ;;  %v533_v0 = vsub.f32 %v511_v18, %v387_v25 }
 0x18d   : > { %v606_v30 = vsub.f32 1.0, %v957_v12  ;;  %v683_v53 = vsel %vm667_vm5, %v651_v54, 0.0  ;;  %v621_v62 = vmul.f32 %v605_v31, %v605_v31  ;;  %966 = vpow2.f32 %v589_v33 }
 0x18e   : > { %v701_v8 = vsel %vm697_vm3, %v683_v53, 0.0  ;;  %v374_v51 = vmul.f32 0.6931472, %v953_v59  ;;  %v591_v23 = vmul.f32 1.442695, %v564_v57  ;;  %v703_v61 = vsel %vm697_vm3, %v684_v52, 0.0  ;;  %v520_v38 = vpop.xlane.xlu1 %519 }
 0x18f   : > { %v622_v24 = vmul.f32 %v606_v30, %v606_v30  ;;  %v702_v36 = vadd.f32 %v701_v8, %v700_v3  ;;  %v653_v1 = vmul.f32 %v637_v32, %v621_v62  ;;  %v1464_v60 = vmax.f32 %v533_v0, -16.118095 }
 0x190   : > { %v959_v34 = vpop.eup %958  ;;  %968 = vpow2.f32 %v591_v23  ;;  %v388_v25 = vadd.f32 %v370_v56, %v1295_v4  ;;  %v389_v29 = vadd.f32 %v372_v11, %v1311_v28  ;;  %v390_v40 = vadd.f32 %v374_v51, %v1303_v16 }
 0x191   : > { %v654_v6 = vmul.f32 %v638_v20, %v622_v24  ;;  %v704_v19 = vadd.f32 %v703_v61, %v702_v36  ;;  %v685_v2 = vsel %vm669_vm6, %v653_v1, 0.0  ;;  %v607_v14 = vsub.f32 1.0, %v959_v34 }
 0x192   : > { %v565_v27 = vmin.f32 %v1464_v60, -1.0000001e-07  ;;  %v705_v59 = vsel %vm697_vm3, %v685_v2, 0.0  ;;  %v534_v35 = vsub.f32 %v514_v21, %v388_v25  ;;  %v535_v58 = vsub.f32 %v517_v9, %v389_v29 }
 0x193   : > { %v686_v32 = vsel %vm670_vm7, %v654_v6, 0.0  ;;  %v706_v63 = vadd.f32 %v705_v59, %v704_v19  ;;  %v623_v56 = vmul.f32 %v607_v14, %v607_v14  ;;  %v536_v52 = vsub.f32 %v520_v38, %v390_v40 }
 0x194   : > { %v961_v20 = vpop.eup %960  ;;  %v707_v4 = vsel %vm697_vm3, %v686_v32, 0.0  ;;  %v593_v28 = vmul.f32 1.442695, %v565_v27  ;;  %v1477_v10 = vmax.f32 %v534_v35, -16.118095  ;;  %v641_v16 = vsub.f32 0.0, %v561_v26 }
 0x195   : > { %v963_v11 = vpop.eup %962  ;;  %v608_v18 = vsub.f32 1.0, %v961_v20  ;;  %v1479_v5 = vmax.f32 %v535_v58, -16.118095  ;;  %v708_v55 = vadd.f32 %v707_v4, %v706_v63  ;;  %v655_v12 = vmul.f32 %v1433_v43, %v623_v56 }
 0x196   : > { %v609_v54 = vsub.f32 1.0, %v963_v11  ;;  %970 = vpow2.f32 %v593_v28  ;;  %v566_v31 = vmin.f32 %v1477_v10, -1.0000001e-07  ;;  %v552_v45 = vmax.f32 %v536_v52, -16.118095 }
 0x197   : > { %v624_v3 = vmul.f32 %v608_v18, %v608_v18  ;;  %v567_v33 = vmin.f32 %v1479_v5, -1.0000001e-07  ;;  %v687_v30 = vsel %vm671_vm8, %v655_v12, 0.0  ;;  %v642_v1 = vsub.f32 0.0, %v562_v15 }
 0x198   : > { %v625_v53 = vmul.f32 %v609_v54, %v609_v54  ;;  %v709_v43 = vsel %vm697_vm3, %v687_v30, 0.0  ;;  %v595_v0 = vmul.f32 1.442695, %v566_v31  ;;  %v568_v9 = vmin.f32 %v552_v45, -1.0000001e-07 }
 0x199   : > { %v656_v62 = vmul.f32 %v1446_v17, %v624_v3  ;;  %v965_v21 = vpop.eup %964  ;;  %v710_v44 = vadd.f32 %v709_v43, %v708_v55  ;;  %v597_v42 = vmul.f32 1.442695, %v567_v33  ;;  %v643_v29 = vsub.f32 0.0, %v563_v13 }
 0x19a   : > { %v657_v8 = vmul.f32 %v641_v16, %v625_v53  ;;  %v967_v24 = vpop.eup %966  ;;  %v610_v26 = vsub.f32 1.0, %v965_v21  ;;  %972 = vpow2.f32 %v595_v0  ;;  %v599_v59 = vmul.f32 1.442695, %v568_v9 }
 0x19b   : > { %v688_v7 = vsel %vm672_vm9, %v656_v62, 0.0  ;;  %v611_v17 = vsub.f32 1.0, %v967_v24  ;;  %974 = vpow2.f32 %v597_v42  ;;  %v644_v15 = vsub.f32 0.0, %v564_v57 }
 0x19c   : > { %v711_v51 = vsel %vm697_vm3, %v688_v7, 0.0  ;;  %v689_v23 = vsel %vm673_vm10, %v657_v8, 0.0  ;;  %v626_v61 = vmul.f32 %v610_v26, %v610_v26  ;;  %976 = vpow2.f32 %v599_v59 }
 0x19d   : > { %v712_v36 = vadd.f32 %v711_v51, %v710_v44  ;;  %v969_v34 = vpop.eup %968  ;;  %v713_v6 = vsel %vm697_vm3, %v689_v23, 0.0  ;;  %v627_v25 = vmul.f32 %v611_v17, %v611_v17  ;;  %v645_v22 = vsub.f32 0.0, %v565_v27  ;;  %v978_v44 = vld [vmem:[%s1202_s28 + $0x78] sm:$0xff] }
 0x19e   : > { %v658_v2 = vmul.f32 %v642_v1, %v626_v61  ;;  %v612_v14 = vsub.f32 1.0, %v969_v34  ;;  %v646_v3 = vsub.f32 0.0, %v566_v31  ;;  %v647_v60 = vsub.f32 0.0, %v567_v33 }
 0x19f   : > { %v714_v19 = vadd.f32 %v713_v6, %v712_v36  ;;  %v659_v32 = vmul.f32 %v643_v29, %v627_v25  ;;  %v648_v31 = vsub.f32 0.0, %v568_v9  ;;  %vm680_vm0 = vcmp.ge.s32.totalorder %v978_v44, 0 }
 0x1a0   : > { %v690_v35 = vsel %vm674_vm11, %v658_v2, 0.0  ;;  %v628_v50 = vmul.f32 %v612_v14, %v612_v14 }
 0x1a1   : > { %v715_v46 = vsel %vm697_vm3, %v690_v35, 0.0  ;;  %v691_v58 = vsel %vm675_vm12, %v659_v32, 0.0 }
 0x1a2   : > { %v716_v13 = vadd.f32 %v715_v46, %v714_v19  ;;  %v660_v20 = vmul.f32 %v644_v15, %v628_v50  ;;  %v717_v63 = vsel %vm697_vm3, %v691_v58, 0.0 }
 0x1a3   : > { %v971_v49 = vpop.eup %970 }
 0x1a4   : > { %v613_v4 = vsub.f32 1.0, %v971_v49  ;;  %v718_v56 = vadd.f32 %v717_v63, %v716_v13  ;;  %v692_v28 = vsel %vm676_vm13, %v660_v20, 0.0 }
 0x1a5   : > { %v719_v37 = vsel %vm697_vm3, %v692_v28, 0.0 }
 0x1a6   : > { %v629_v38 = vmul.f32 %v613_v4, %v613_v4  ;;  %v720_v39 = vadd.f32 %v719_v37, %v718_v56 }
 0x1a7   : > { %v973_v57 = vpop.eup %972 }
 0x1a8   : > { %v661_v11 = vmul.f32 %v645_v22, %v629_v38  ;;  %v975_v18 = vpop.eup %974  ;;  %v614_v40 = vsub.f32 1.0, %v973_v57 }
 0x1a9   : > { %v615_v12 = vsub.f32 1.0, %v975_v18  ;;  %v977_v53 = vpop.eup %976 }
 0x1aa   : > { %v693_v55 = vsel %vm677_vm14, %v661_v11, 0.0  ;;  %v630_v54 = vmul.f32 %v614_v40, %v614_v40  ;;  %v616_v43 = vsub.f32 1.0, %v977_v53 }
 0x1ab   : > { %v631_v52 = vmul.f32 %v615_v12, %v615_v12  ;;  %v721_v47 = vsel %vm697_vm3, %v693_v55, 0.0 }
 0x1ac   : > { %v662_v27 = vmul.f32 %v646_v3, %v630_v54  ;;  %v722_v30 = vadd.f32 %v721_v47, %v720_v39  ;;  %v632_v41 = vmul.f32 %v616_v43, %v616_v43 }
 0x1ad   : > { %v663_v16 = vmul.f32 %v647_v60, %v631_v52 }
 0x1ae   : > { %v694_v62 = vsel %vm678_vm15, %v662_v27, 0.0  ;;  %v664_v33 = vmul.f32 %v648_v31, %v632_v41 }
 0x1af   : > { %v695_v0 = vsel %vm679_vm1, %v663_v16, 0.0  ;;  %v723_v10 = vsel %vm697_vm3, %v694_v62, 0.0 }
 0x1b0   : > { %v724_v21 = vadd.f32 %v723_v10, %v722_v30  ;;  %v725_v5 = vsel %vm697_vm3, %v695_v0, 0.0  ;;  %v696_v48 = vsel %vm680_vm0, %v664_v33, 0.0 }
 0x1b1   : > { %v727_v42 = vsel %vm697_vm3, %v696_v48, 0.0 }
 0x1b2   : > { %v726_v8 = vadd.f32 %v725_v5, %v724_v21 }
 0x1b4   : > { %v728_v24 = vadd.f32 %v727_v42, %v726_v8 }
 0x1b6   : > { %729 = vadd.xlane.f32.xlu0 %v728_v24 }
 0x23f   : > { %v730_v7 = vpop.xlane.xlu0 %729 }
 0x240   : > { %v731_v26 = vrot.slane %v730_v7, 4 }
 0x242   : > { %v732_v45 = vadd.f32 %v731_v26, %v730_v7 }
 0x244   : > { %v733_v51 = vrot.slane %v732_v45, 2 }
 0x246   : > { %v734_v23 = vadd.f32 %v733_v51, %v732_v45 }
 0x248   : > { %v735_v17 = vrot.slane %v734_v23, 1 }
 0x24a   : > { %v736_v36 = vadd.f32 %v735_v17, %v734_v23 }
 0x24c   : > { %838 = vpush %v736_v36 }
 0x27d   : > { %s839_s6 = spop %838 }
 0x27e   : > { %v738_v61 = vstv %s839_s6 }
 0x27f   : > { %739 = vst [vmem:[%s153_s3] sm:$0xff] %v738_v61 }
 0x280   : > { %992 = shalt.err (!%p989_p3)
}
 0x281   : > { %s993_s23 = scalar_lea.hbm %s752_s14, 128  ;;  %s997_s26 = scalar_lea.hbm %s1569_s2, 512 }
 0x282   : > { %p994_p4 = scmp.ne.s32.totalorder %s752_s14, %s993_s23  ;;  %p998_p9 = scmp.lt.s32.totalorder %s752_s14, %s1569_s2 }
 0x283   : > { %p999_p10 = scmp.lt.s32.totalorder %s997_s26, %s993_s23 }
 0x284   : > { %p995_p7 = pnand %p994_p4, %p1096_p5 }
 0x285   : > { %p1000_p11 = por %p999_p10, %p998_p9 }
 0x286   : > { %p996_p8 = pneg %p995_p7 }
 0x288   : > { %p1001_p12 = pnand %p1000_p11, %p996_p8 }
 0x28a   : > { %1004 = shalt.err (!%p1001_p12)
}
 0x28b   : > { %840 = dma.vmem_to_hbm [thread:$0]  (%p1096_p5), %s1529_s4, 128, %s752_s14, %s741_s16  }
 0x28c PF: > { %p846_p13 = scmp.ge.s32.totalorder %s1039_s12, 2  ;;  %s766_s29 = sand.u32 1, %s1027_s9  }
 0x28d   : > { %s767_s30 = scalar_lea.sflag [#allocation3], %s766_s29 }
 0x28e   : > { %p843_p0 = pnand %p846_p13, %p1100_p6 }
 0x290   : > { %p844_p1 = pneg %p843_p0 }
 0x292   : > { %1022 = dma.done.wait (%p844_p1), %s767_s30, 128  }
 0x293   : > { %1024 = vsyncadd (%p844_p1), %s767_s30, 4294967168  ;;  %p12_p2 = scmp.ge.s32.totalorder %s1083_s15, 6   ;;  %s1572_s9 = smov %s1031_s10 }
 0x294   : > { %s1573_s10 = smov %s1035_s11  ;;  %s1574_s11 = smov %s1094_s18 }
 0x295   : > { %s1575_s12 = smov %s1083_s15  ;;  %14 = sbr.rel (!%p12_p2) target bundleno = 3 (0x3), region = 66 }
 0x29a   :  { %772 = vsyncpa [#allocation3], 1 }
 0x29b   :  { %774 = vsyncpa [#allocation3 + $0x1], 1 }

</bundles_post_ra>
